<compile_context>
chip_gen: v7x
topology: tpu7x:2x2x1
jax: 0.10.0
libtpu: 0.0.40
codegen_flags: <defaults>
</compile_context>

<pallas_src>
import functools
import math

import jax
import jax.numpy as jnp
from jax.experimental import pallas as pl
from jax.experimental.pallas import tpu as pltpu


# ----------------------------------------------------------------------------
# Sublane-padding-aware VMEM accounting
# ----------------------------------------------------------------------------
def _padded_lane_bytes(rows, dtype):
    """Bytes per lane that a (rows, tile_n) VMEM block really occupies:
    rows pad up to the dtype's minimum sublane tile (8 for 4B, 16 for 2B,
    32 for 1B dtypes)."""
    itemsize = jnp.dtype(dtype).itemsize
    min_sub = 8 * max(4 // itemsize, 1)
    padded_rows = -(-rows // min_sub) * min_sub
    return padded_rows * itemsize


def _per_lane_bytes(c, x_dtype, y_dtype, out_dtype):
    # X, Y and (conservatively) the output block, each double-buffered.
    return 2 * (_padded_lane_bytes(c, x_dtype)
                + _padded_lane_bytes(1, y_dtype)
                + _padded_lane_bytes(1, out_dtype))


def _pick_tile_n(hw, per_lane_bytes, budget_bytes=20 * 1024 * 1024,
                 max_tile=65536):
    t = budget_bytes // max(per_lane_bytes, 1)
    t = min(int(t), max_tile)
    t = max((t // 128) * 128, 128)
    if hw <= t:
        return hw                     # full-extent block (allowed even if not %128)
    return t


# ----------------------------------------------------------------------------
# In-kernel helpers
# ----------------------------------------------------------------------------
def _first_argmax_f32(x):
    """First-occurrence argmax over axis 0, returned as (1, N) float32.

    Uses only max / min sublane reductions + elementwise compares, so it
    lowers cleanly for both f32 and bf16 inputs (no f32 upcast of the
    whole block needed on v6e/v7x)."""
    if x.dtype not in (jnp.float32, jnp.bfloat16):
        x = x.astype(jnp.float32)
    c = x.shape[0]
    m = jnp.max(x, axis=0, keepdims=True)                               # (1, N)
    idx = jax.lax.broadcasted_iota(jnp.int32, x.shape, 0).astype(jnp.float32)
    cand = jnp.where(x == m, idx, jnp.float32(c))                       # (C, N)
    return jnp.min(cand, axis=0, keepdims=True)                         # (1, N)


def _predict(x, num_classes, threshold):
    if num_classes == 1:
        return jnp.where(x.astype(jnp.float32) >= threshold, 1.0, 0.0)
    return _first_argmax_f32(x)


# ----------------------------------------------------------------------------
# Kernels
# ----------------------------------------------------------------------------
def _acc_sum_kernel(x_ref, y_ref, out_ref, *, num_classes, threshold, hw,
                    tile_n, num_j, num_j_split):
    """Accumulate per-lane match counts into a VMEM-resident (1, tile_n) block.

    Grid = (n_split, B, num_j_split); the output block index is constant
    along the innermost (pixel) axis, so it stays resident per (split, batch).
    """
    s = pl.program_id(0)
    j = pl.program_id(2)

    @pl.when(j == 0)
    def _():
        out_ref[...] = jnp.zeros_like(out_ref)

    x = x_ref[...]                                   # (C, tile_n), native dtype
    y = y_ref[...].astype(jnp.float32)               # (1, tile_n)

    pred = _predict(x, num_classes, threshold)
    matches = (pred == y).astype(jnp.float32)        # (1, tile_n)

    if hw % tile_n != 0:
        gj = s * num_j_split + j                     # global pixel-block index

        # Full tiles: plain add (no per-step iota / where).
        @pl.when(gj < num_j - 1)
        def _():
            out_ref[...] += matches

        # Only the single global tail block needs lane masking.
        @pl.when(gj == num_j - 1)
        def _():
            lane = jax.lax.broadcasted_iota(jnp.int32, matches.shape, 1)
            remaining = hw - gj * tile_n
            out_ref[...] += jnp.where(lane < remaining, matches, 0.0)
    else:
        out_ref[...] += matches


def _acc_map_kernel(x_ref, y_ref, out_ref, *, num_classes, threshold):
    """Per-pixel boolean accuracy map (mean=False path)."""
    x = x_ref[...]
    y = y_ref[...].astype(jnp.float32)
    pred = _predict(x, num_classes, threshold)
    out_ref[...] = pred == y


# ----------------------------------------------------------------------------
# Wrapper (mirrors Accuracy.forward)
# ----------------------------------------------------------------------------
def accuracy(X, Y, *, mean=True, threshold=0.5, from_logits=False, tile_n=None):
    """X: (B, C, H, W) predictions; Y: (B, 1, H, W) or (B, H, W) targets."""
    B, C, H, W = X.shape
    HW = H * W

    if Y.ndim != X.ndim:
        Y = Y[:, None]                               # unsqueeze(1)
    if Y.shape[1] != 1:
        # TODO(synk): torch-style broadcasting of preds against a (B,C>1,H,W)
        # target is not implemented; targets must be index/binary maps.
        raise NotImplementedError("Y must have a single channel")

    # from_logits: softmax is argmax-invariant (C>1); for C==1 fold the
    # sigmoid into a logit-space threshold -> no extra HBM pass over X.
    eff_threshold = float(threshold)
    if from_logits and C == 1:
        if threshold <= 0.0:
            eff_threshold = float("-inf")
        elif threshold >= 1.0:
            eff_threshold = float("inf")
        else:
            eff_threshold = math.log(threshold) - math.log1p(-threshold)

    # Free contiguous reshapes; keep native dtypes (casts happen per-tile).
    Xr = X.reshape(B, C, HW)
    Yr = Y.reshape(B, 1, HW)
    # TODO(synk): for C == 1 a sublane-dense (8, tile) layout of the flat
    # pixel axis would give 8x denser vregs; current path is still lane-dense.

    out_dtype = jnp.float32 if mean else jnp.bool_
    per_lane = _per_lane_bytes(C, Xr.dtype, Yr.dtype, out_dtype)

    auto_tile = tile_n is None
    if auto_tile:
        tile_n = _pick_tile_n(HW, per_lane)
    else:
        # Clamp / round user-supplied tiles so the (.,128) lane rule holds.
        tile_n = int(tile_n)
        tile_n = HW if tile_n >= HW else min(max((tile_n // 128) * 128, 128), HW)

    num_j = pl.cdiv(HW, tile_n)

    if mean:
        # v7x megacore: with B == 1 the batch axis alone can't feed both
        # TensorCores -> add a size-2 "parallel" pixel-split axis; each half
        # owns its own resident accumulator slab, summed exactly below.
        n_split = 1
        if B == 1 and num_j >= 2:
            if num_j % 2 != 0 and auto_tile:
                alt = 128 * pl.cdiv(pl.cdiv(HW, num_j + 1), 128)
                if 128 <= alt < HW and pl.cdiv(HW, alt) % 2 == 0:
                    tile_n = alt
                    num_j = pl.cdiv(HW, tile_n)
            if num_j % 2 == 0:
                n_split = 2
        num_j_split = num_j // n_split

        vmem_limit = int(min(max(32 << 20, tile_n * per_lane + (8 << 20)),
                             56 << 20))

        kernel = functools.partial(
            _acc_sum_kernel, num_classes=C, threshold=eff_threshold, hw=HW,
            tile_n=tile_n, num_j=num_j, num_j_split=num_j_split)

        in_specs = [
            pl.BlockSpec((pl.Squeezed(), C, tile_n),
                         lambda s, b, j, nj=num_j_split: (b, 0, s * nj + j)),
            pl.BlockSpec((pl.Squeezed(), 1, tile_n),
                         lambda s, b, j, nj=num_j_split: (b, 0, s * nj + j)),
        ]
        partials = pl.pallas_call(
            kernel,
            out_shape=jax.ShapeDtypeStruct((n_split, B, 1, tile_n), jnp.float32),
            grid=(n_split, B, num_j_split),
            in_specs=in_specs,
            # constant block index along j => VMEM-resident accumulator
            out_specs=pl.BlockSpec((pl.Squeezed(), pl.Squeezed(), 1, tile_n),
                                   lambda s, b, j: (s, b, 0, 0)),
            compiler_params=pltpu.CompilerParams(
                dimension_semantics=("parallel", "parallel", "arbitrary"),
                vmem_limit_bytes=vmem_limit),
        )(Xr, Yr)
        # Exact integer reduction of the tiny partial slab, then the mean.
        total = jnp.sum(partials.astype(jnp.int32))
        return total.astype(jnp.float32) / jnp.float32(B * HW)
    else:
        vmem_limit = int(min(max(32 << 20, tile_n * per_lane + (8 << 20)),
                             56 << 20))
        kernel = functools.partial(_acc_map_kernel, num_classes=C,
                                   threshold=eff_threshold)
        in_specs = [
            pl.BlockSpec((pl.Squeezed(), C, tile_n), lambda b, j: (b, 0, j)),
            pl.BlockSpec((pl.Squeezed(), 1, tile_n), lambda b, j: (b, 0, j)),
        ]
        acc_flat = pl.pallas_call(
            kernel,
            out_shape=jax.ShapeDtypeStruct((B, 1, HW), jnp.bool_),
            grid=(B, num_j),
            in_specs=in_specs,
            out_specs=pl.BlockSpec((pl.Squeezed(), 1, tile_n),
                                   lambda b, j: (b, 0, j)),
            compiler_params=pltpu.CompilerParams(
                dimension_semantics=("parallel", "parallel"),
                vmem_limit_bytes=vmem_limit),
        )(Xr, Yr)
        return acc_flat.reshape(B, 1, H, W)


# ----------------------------------------------------------------------------
# Demo / self-check
# ----------------------------------------------------------------------------
if __name__ == "__main__":
    key = jax.random.PRNGKey(0)
    kx, ky, kx2, ky2, kx3, ky3 = jax.random.split(key, 6)

    # --- multiclass, mean=True -------------------------------------------
    B, C, H, W = 2, 4, 16, 16
    X = jax.random.normal(kx, (B, C, H, W), dtype=jnp.float32)
    Y = jax.random.randint(ky, (B, 1, H, W), 0, C).astype(jnp.float32)

    acc_mean = jax.block_until_ready(accuracy(X, Y, mean=True))
    ref = jnp.mean(
        (jnp.argmax(X, axis=1, keepdims=True).astype(jnp.float32) == Y)
        .astype(jnp.float32))
    assert jnp.allclose(acc_mean, ref), (acc_mean, ref)

    # --- multiclass, mean=False (boolean map) -----------------------------
    acc_map = jax.block_until_ready(accuracy(X, Y, mean=False))
    ref_map = jnp.argmax(X, axis=1, keepdims=True).astype(jnp.float32) == Y
    assert acc_map.shape == (B, 1, H, W)
    assert bool(jnp.all(acc_map == ref_map))

    # --- native bf16 inputs (no in-kernel f32 upcast of the block) ---------
    Xb16 = X.astype(jnp.bfloat16)
    acc_b16 = jax.block_until_ready(accuracy(Xb16, Y, mean=True))
    ref_b16 = jnp.mean(
        (jnp.argmax(Xb16, axis=1, keepdims=True).astype(jnp.float32) == Y)
        .astype(jnp.float32))
    assert jnp.allclose(acc_b16, ref_b16), (acc_b16, ref_b16)

    # --- ragged pixel count, B=2 (forced small tile -> guarded tail mask) --
    H2, W2 = 20, 20                       # HW = 400, tile 128 -> 16-lane tail
    X2 = jax.random.normal(kx2, (B, C, H2, W2), dtype=jnp.float32)
    Y2 = jax.random.randint(ky2, (B, 1, H2, W2), 0, C).astype(jnp.float32)
    acc2 = jax.block_until_ready(accuracy(X2, Y2, mean=True, tile_n=128))
    ref2 = jnp.mean(
        (jnp.argmax(X2, axis=1, keepdims=True).astype(jnp.float32) == Y2)
        .astype(jnp.float32))
    assert jnp.allclose(acc2, ref2), (acc2, ref2)

    # --- B == 1: pixel-split parallel axis + ragged tail -------------------
    X3 = jax.random.normal(kx3, (1, 3, H2, W2), dtype=jnp.float32)
    Y3 = jax.random.randint(ky3, (1, 1, H2, W2), 0, 3).astype(jnp.float32)
    acc3 = jax.block_until_ready(accuracy(X3, Y3, mean=True, tile_n=128))
    ref3 = jnp.mean(
        (jnp.argmax(X3, axis=1, keepdims=True).astype(jnp.float32) == Y3)
        .astype(jnp.float32))
    assert jnp.allclose(acc3, ref3), (acc3, ref3)

    # --- B == 1, large image: auto big tiles + split, multi-step accum -----
    X4 = jax.random.normal(kx2, (1, 2, 512, 512), dtype=jnp.float32)
    Y4 = jax.random.randint(ky2, (1, 1, 512, 512), 0, 2).astype(jnp.float32)
    acc4 = jax.block_until_ready(accuracy(X4, Y4, mean=True))
    ref4 = jnp.mean(
        (jnp.argmax(X4, axis=1, keepdims=True).astype(jnp.float32) == Y4)
        .astype(jnp.float32))
    assert jnp.allclose(acc4, ref4), (acc4, ref4)

    # --- binary / from_logits (logit-space threshold, no sigmoid HBM pass) -
    Xbin = jax.random.normal(kx, (B, 1, H, W), dtype=jnp.float32)
    Ybin = jax.random.randint(ky, (B, 1, H, W), 0, 2).astype(jnp.float32)
    acc_bin = jax.block_until_ready(
        accuracy(Xbin, Ybin, mean=True, from_logits=True))
    ref_bin = jnp.mean(
        ((jax.nn.sigmoid(Xbin) >= 0.5).astype(jnp.float32) == Ybin)
        .astype(jnp.float32))
    assert jnp.allclose(acc_bin, ref_bin), (acc_bin, ref_bin)

    print("KERNEL_OK")
</pallas_src>

<mosaic_0001>
module attributes {stable_mosaic.version = 11 : i64} {
  func.func @_acc_sum_kernel(%arg0: i32, %arg1: i32, %arg2: i32, %arg3: memref<1x4x256xf32, #tpu.memory_space<vmem>>, %arg4: memref<1x1x256xf32, #tpu.memory_space<vmem>>, %arg5: memref<1x1x1x256xf32, #tpu.memory_space<vmem>>) attributes {dimension_semantics = [#tpu.dimension_semantics<parallel>, #tpu.dimension_semantics<parallel>, #tpu.dimension_semantics<arbitrary>], iteration_bounds = array<i64: 1, 2, 1>, scalar_prefetch = 0 : i64, scratch_operands = 0 : i64, tpu.core_type = #tpu.core_type<tc>, window_params = [{transform_indices = @transform_0, window_bounds = array<i64: 1, 4, 256>}, {transform_indices = @transform_1, window_bounds = array<i64: 1, 1, 256>}, {transform_indices = @transform_2, window_bounds = array<i64: 1, 1, 1, 256>}]} {
    %c0_i32 = arith.constant 0 : i32
    %0 = arith.cmpi eq, %arg2, %c0_i32 : i32
    %1 = arith.extui %0 : i1 to i32
    %c0_i32_0 = arith.constant 0 : i32
    %2 = arith.cmpi ne, %1, %c0_i32_0 : i32
    scf.if %2 {
      %cst_16 = arith.constant 0.000000e+00 : f32
      %26 = vector.broadcast %cst_16 : f32 to vector<1x256xf32>
      %c0_17 = arith.constant 0 : index
      %c0_18 = arith.constant 0 : index
      %c0_19 = arith.constant 0 : index
      %c0_20 = arith.constant 0 : index
      %27 = vector.load %arg5[%c0_17, %c0_18, %c0_19, %c0_20] : memref<1x1x1x256xf32, #tpu.memory_space<vmem>>, vector<1x1x1x256xf32>
      %28 = vector.shape_cast %27 : vector<1x1x1x256xf32> to vector<1x256xf32>
      %29 = vector.shape_cast %26 : vector<1x256xf32> to vector<1x1x1x256xf32>
      tpu.vector_store %arg5[%c0_17, %c0_18, %c0_19, %c0_20], %29 {strides = array<i32>} : memref<1x1x1x256xf32, #tpu.memory_space<vmem>>, vector<1x1x1x256xf32>,
    } else {
    }
    %c0 = arith.constant 0 : index
    %c0_1 = arith.constant 0 : index
    %c0_2 = arith.constant 0 : index
    %3 = vector.load %arg3[%c0, %c0_1, %c0_2] : memref<1x4x256xf32, #tpu.memory_space<vmem>>, vector<1x4x256xf32>
    %4 = vector.shape_cast %3 : vector<1x4x256xf32> to vector<4x256xf32>
    %c0_3 = arith.constant 0 : index
    %c0_4 = arith.constant 0 : index
    %c0_5 = arith.constant 0 : index
    %5 = vector.load %arg4[%c0_3, %c0_4, %c0_5] : memref<1x1x256xf32, #tpu.memory_space<vmem>>, vector<1x1x256xf32>
    %6 = vector.shape_cast %5 : vector<1x1x256xf32> to vector<1x256xf32>
    %cst = arith.constant dense<0xFF800000> : vector<256xf32>
    %7 = vector.multi_reduction <maximumf>, %4, %cst [0] : vector<4x256xf32> to vector<256xf32>
    %8 = vector.shape_cast %7 : vector<256xf32> to vector<1x256xf32>
    %9 = tpu.iota {dimensions = array<i32: 0>} : vector<4x256xi32>
    %10 = arith.sitofp %9 : vector<4x256xi32> to vector<4x256xf32>
    %11 = vector.broadcast %8 : vector<1x256xf32> to vector<4x256xf32>
    %12 = arith.cmpf oeq, %4, %11 : vector<4x256xf32>
    %cst_6 = arith.constant 4.000000e+00 : f32
    %13 = vector.broadcast %cst_6 : f32 to vector<4x256xf32>
    %14 = arith.select %12, %10, %13 : vector<4x256xi1>, vector<4x256xf32>
    %cst_7 = arith.constant dense<0x7F800000> : vector<256xf32>
    %15 = vector.multi_reduction <minimumf>, %14, %cst_7 [0] : vector<4x256xf32> to vector<256xf32>
    %16 = vector.shape_cast %15 : vector<256xf32> to vector<1x256xf32>
    %17 = arith.cmpf oeq, %16, %6 : vector<1x256xf32>
    %18 = arith.extui %17 : vector<1x256xi1> to vector<1x256xi32>
    %19 = arith.sitofp %18 : vector<1x256xi32> to vector<1x256xf32>
    %c0_8 = arith.constant 0 : index
    %c0_9 = arith.constant 0 : index
    %c0_10 = arith.constant 0 : index
    %c0_11 = arith.constant 0 : index
    %20 = vector.load %arg5[%c0_8, %c0_9, %c0_10, %c0_11] : memref<1x1x1x256xf32, #tpu.memory_space<vmem>>, vector<1x1x1x256xf32>
    %21 = vector.shape_cast %20 : vector<1x1x1x256xf32> to vector<1x256xf32>
    %22 = arith.addf %21, %19 : vector<1x256xf32>
    %c0_12 = arith.constant 0 : index
    %c0_13 = arith.constant 0 : index
    %c0_14 = arith.constant 0 : index
    %c0_15 = arith.constant 0 : index
    %23 = vector.load %arg5[%c0_12, %c0_13, %c0_14, %c0_15] : memref<1x1x1x256xf32, #tpu.memory_space<vmem>>, vector<1x1x1x256xf32>
    %24 = vector.shape_cast %23 : vector<1x1x1x256xf32> to vector<1x256xf32>
    %25 = vector.shape_cast %22 : vector<1x256xf32> to vector<1x1x1x256xf32>
    tpu.vector_store %arg5[%c0_12, %c0_13, %c0_14, %c0_15], %25 {strides = array<i32>} : memref<1x1x1x256xf32, #tpu.memory_space<vmem>>, vector<1x1x1x256xf32>,
    return
  }
  func.func @transform_0(%arg0: i32, %arg1: i32, %arg2: i32) -> (i32, i32, i32) {
    %c1_i32 = arith.constant 1 : i32
    %0 = arith.muli %arg0, %c1_i32 : i32
    %1 = arith.addi %0, %arg2 : i32
    %c0_i32 = arith.constant 0 : i32
    %c0_i32_0 = arith.constant 0 : i32
    return %arg1, %c0_i32, %1 : i32, i32, i32
  }
  func.func @transform_1(%arg0: i32, %arg1: i32, %arg2: i32) -> (i32, i32, i32) {
    %c1_i32 = arith.constant 1 : i32
    %0 = arith.muli %arg0, %c1_i32 : i32
    %1 = arith.addi %0, %arg2 : i32
    %c0_i32 = arith.constant 0 : i32
    %c0_i32_0 = arith.constant 0 : i32
    return %arg1, %c0_i32, %1 : i32, i32, i32
  }
  func.func @transform_2(%arg0: i32, %arg1: i32, %arg2: i32) -> (i32, i32, i32, i32) {
    %c0_i32 = arith.constant 0 : i32
    %c0_i32_0 = arith.constant 0 : i32
    %c0_i32_1 = arith.constant 0 : i32
    return %arg0, %arg1, %c0_i32, %c0_i32_0 : i32, i32, i32, i32
  }
}

</mosaic_0001>

<bundles_post_ra>
// kernel: tpu_custom_call.1
= control target key start
LH: loop header
LB: loop body
LE: loop exit
PB: predicated region body
PF: predicated region fallthrough
CT: control target
= control target key end

     0   :  { %7 = vsyncpa [#allocation3], 0  ;;  %s975_s0 = inlined_call_operand.hbm [shape: f32[2,4,256], index: 0, kind: input, shape index: {}]   ;;  %s976_s1 = inlined_call_operand.hbm [shape: f32[2,1,256], index: 1, kind: input, shape index: {}]   ;;  %s977_s2 = inlined_call_operand.hbm [shape: f32[1,2,1,256], index: 2, kind: output, shape index: {}]  }
   0x1   :  { %9 = vsyncpa [#allocation3 + $0x1], 0 }
   0x2   :  { %10 = vsyncpa [#allocation6], 0 }
   0x3   :  { %12 = vsyncpa [#allocation6 + $0x1], 0 }
   0x4   :  { %13 = vsyncpa [#allocation4], 0 }
   0x5   :  { %15 = vsyncpa [#allocation4 + $0x1], 0  ;;  %s739_s9 = smov 0   ;;  %s741_s10 = smov 0  }
   0x6   :  { %s743_s11 = smov 0   ;;  %s745_s12 = smov 0  }
   0x7   :  { %s747_s13 = smov 0   ;;  %s749_s14 = smov 0  }
   0x8 LB: > { %s475_s15 = sadd.s32 4294967295, %s716_s14   ;;  %s476_s16 = sadd.s32 4294967294, %s716_s14   ;;  %s716_s14 = sphi %s749_s14, %s21_s14   ;;  %s712_s13 = sphi %s747_s13, %s999_s13   ;;  %s708_s12 = sphi %s745_s12, %s998_s12   ;;  %s704_s11 = sphi %s743_s11, %s997_s11   ;;  %s700_s10 = sphi %s741_s10, %s996_s10   ;;  %s696_s9 = sphi %s739_s9, %s995_s9  }
   0x9   : > { %s36_s17 = sadd.s32 1, %s712_s13  ;;  %s51_s18 = sadd.s32 1, %s704_s11 }
   0xa   : > { %p38_p0 = scmp.ge.s32.totalorder %s36_s17, 2  ;;  %p58_p1 = scmp.ne.s32.totalorder %s704_s11, %s700_s10 }
   0xb   : > { %p59_p2 = scmp.eq.s32.totalorder %s716_s14, 0  ;;  %p64_p3 = scmp.ne.s32.totalorder %s700_s10, %s696_s9 }
   0xc   : > { %s1001_s17 = smov (%p38_p0, %s36_s17), 0  ;;  %p65_p5 = scmp.eq.s32.totalorder %s475_s15, 0 }
   0xd   : > { %p780_p4 = por %p59_p2, %p58_p1  ;;  %s46_s20 = ssub.s32 %s712_s13, %s1001_s17 }
   0xe   : > { %p120_p6 = scmp.eq.s32.totalorder %s475_s15, 1  ;;  %p49_p7 = scmp.eq.s32.totalorder %s46_s20, 0 }
   0xf   : > { %p786_p8 = por %p65_p5, %p64_p3  ;;  %p126_p10 = scmp.eq.s32.totalorder %s476_s16, 1 }
  0x10   : > { %p790_p9 = por %p120_p6, %p58_p1  ;;  %p516_p13 = scmp.lt.s32.totalorder %s716_s14, 2 }
  0x11   : > { %s981_s21 = scalar_select %p786_p8, 1, 0 }
  0x12   : > { %s982_s22 = scalar_select %p790_p9, 1, 0 }
  0x13   : > { %s795_s23 = scalar_select %p49_p7, %s704_s11, %s51_s18  }
  0x14   : > { %p797_p11 = por %p126_p10, %p64_p3  ;;  %s804_s25 = sand.u32 1, %s704_s11  }
  0x15   : > { %s479_s26 = sshll.u32 %s804_s25, 3  ;;  %s496_s27 = sshll.u32 %s712_s13, 7 }
  0x16   : > { %s983_s24 = scalar_select %p797_p11, 1, 0 }
  0x17   : > { %s811_s30 = scalar_lea.hbm %s975_s0, %s496_s27  ;;  %s150_s3 = scalar_lea.vmem [#allocation2], %s479_s26 }
  0x18   : > { %s161_s4 = sshll.u32 %s150_s3, 4  ;;  %p817_p0 = pnand %p516_p13, %p780_p4  ;;  %s813_s4 = int_to_ptr.vmem [resolvable:$true] %s161_s4 }
  0x19   : > { %s147_s6 = scalar_lea.sflag [#allocation3], %s804_s25  ;;  %s570_s7 = scalar_lea.hbm %s811_s30, 128 }
  0x1a   : > { %p571_p3 = scmp.ne.s32.totalorder %s811_s30, %s570_s7  ;;  %p572_p5 = pneg %p817_p0 }
  0x1b   : > { %s575_s16 = scalar_lea.hbm %s975_s0, 256  ;;  %p576_p4 = scmp.lt.u32.totalorder %s811_s30, %s975_s0 }
  0x1c   : > { %p573_p6 = pnand %p572_p5, %p571_p3  ;;  %p577_p10 = scmp.lt.u32.totalorder %s575_s16, %s570_s7 }
  0x1d   : > { %p579_p12 = scmp.lt.u32.totalorder %s570_s7, %s811_s30 }
  0x1e   : > { %p574_p7 = pneg %p573_p6  ;;  %p578_p13 = por %p577_p10, %p576_p4 }
  0x20   : > { %p580_p1 = por %p579_p12, %p578_p13 }
  0x22   : > { %p581_p2 = pnand %p580_p1, %p574_p7 }
  0x24   : > { %584 = shalt.err (!%p581_p2)
}
  0x25   : > { %s585_s20 = scalar_lea.vmem %s813_s4, 128  ;;  %s718_s26 = smov [#allocation2]  }
  0x26   : > { %p586_p3 = scmp.ne.s32.totalorder %s813_s4, %s585_s20  ;;  %s590_s27 = sshll.u32 %s718_s26, 4  ;;  %s591_s27 = int_to_ptr.vmem [resolvable:$false] %s590_s27 }
  0x27   : > { %s592_s28 = scalar_lea.vmem %s591_s27, 256  ;;  %p593_p9 = scmp.lt.s32.totalorder %s813_s4, %s591_s27 }
  0x28   : > { %p588_p6 = pnand %p586_p3, %p572_p5  ;;  %p594_p4 = scmp.lt.s32.totalorder %s592_s28, %s585_s20 }
  0x2a   : > { %p589_p11 = pneg %p588_p6  ;;  %p595_p10 = por %p594_p4, %p593_p9 }
  0x2c   : > { %p596_p12 = pnand %p595_p10, %p589_p11 }
  0x2e   : > { %599 = shalt.err (!%p596_p12)
}
  0x2f   : > { %508 = dma.hbm_to_vmem [thread:$0]  (!%p817_p0), %s811_s30, 128, %s813_s4, %s147_s6  }
  0x30   : > { %p985_p1 = scmp.lt.s32.totalorder %s716_s14, 3  ;;  %p986_p2 = scmp.ge.s32.totalorder %s716_s14, 1 }
  0x31   : > { %s482_s3 = sshll.u32 %s804_s25, 1  ;;  %s497_s7 = sshll.u32 %s712_s13, 5 }
  0x32   : > { %p853_p7 = pnand %p986_p2, %p985_p1  ;;  %s862_s16 = scalar_lea.hbm %s976_s1, %s497_s7 }
  0x33   : > { %s172_s18 = scalar_lea.vmem [#allocation5], %s482_s3  ;;  %s169_s30 = scalar_lea.sflag [#allocation6], %s804_s25 }
  0x34   : > { %s987_s29 = scalar_select %p853_p7, 1, 0 }
  0x35   : > { %s183_s19 = sshll.u32 %s172_s18, 4  ;;  %s600_s4 = scalar_lea.hbm %s862_s16, 32  ;;  %s184_s19 = int_to_ptr.vmem [resolvable:$true] %s183_s19 }
  0x36   : > { %p601_p9 = scmp.ne.s32.totalorder %s862_s16, %s600_s4  ;;  %s605_s26 = scalar_lea.hbm %s976_s1, 64 }
  0x37   : > { %p606_p3 = scmp.lt.u32.totalorder %s862_s16, %s976_s1  ;;  %p607_p6 = scmp.lt.u32.totalorder %s605_s26, %s600_s4 }
  0x38   : > { %p603_p11 = pnand %p601_p9, %p572_p5  ;;  %p609_p10 = scmp.lt.u32.totalorder %s600_s4, %s862_s16 }
  0x39   : > { %p608_p4 = por %p607_p6, %p606_p3 }
  0x3a   : > { %p604_p13 = pneg %p603_p11 }
  0x3b   : > { %p610_p12 = por %p609_p10, %p608_p4 }
  0x3d   : > { %p611_p1 = pnand %p610_p12, %p604_p13 }
  0x3f   : > { %614 = shalt.err (!%p611_p1)
}
  0x40   : > { %s615_s25 = scalar_lea.vmem %s184_s19, 32  ;;  %s719_s3 = smov [#allocation5]  }
  0x41   : > { %p616_p2 = scmp.ne.s32.totalorder %s184_s19, %s615_s25  ;;  %s620_s7 = sshll.u32 %s719_s3, 4  ;;  %s621_s7 = int_to_ptr.vmem [resolvable:$false] %s620_s7 }
  0x42   : > { %s622_s8 = scalar_lea.vmem %s621_s7, 64  ;;  %p623_p8 = scmp.lt.s32.totalorder %s184_s19, %s621_s7 }
  0x43   : > { %p618_p9 = pnand %p616_p2, %p572_p5  ;;  %p624_p7 = scmp.lt.s32.totalorder %s622_s8, %s615_s25 }
  0x45   : > { %p619_p11 = pneg %p618_p9  ;;  %p625_p3 = por %p624_p7, %p623_p8 }
  0x47   : > { %p626_p6 = pnand %p625_p3, %p619_p11 }
  0x49   : > { %629 = shalt.err (!%p626_p6)
}
  0x4a   : > { %511 = dma.hbm_to_vmem [thread:$0]  (!%p817_p0), %s862_s16, 32, %s184_s19, %s169_s30  }
  0x4b   : > { %p988_p13 = scmp.ne.s32.totalorder %s987_s29, 0 }
  0x4c   : > { %s887_s15 = sand.u32 (!%p988_p13), 1, %s700_s10   ;;  %p989_p5 = scmp.ne.s32.totalorder (!%p988_p13), %s981_s21, 0 }
  0x4d   : > { %192 = sbr.rel (%p988_p13) target bundleno = 147 (0x93), region = 28  ;;  %s486_s18 = sshll.u32 (!%p988_p13), %s887_s15, 3 }
  0x4e   : > { %s195_s4 = scalar_lea.sflag (!%p988_p13), [#allocation3], %s887_s15  ;;  %s198_s6 = scalar_lea.vmem (!%p988_p13), [#allocation2], %s486_s18 }
  0x54   : > { %683 = dma.done.wait (%p989_p5), %s195_s4, 128  }
  0x55   : > { %685 = vsyncadd (%p989_p5), %s195_s4, 4294967168  ;;  %s487_s5 = sshll.u32 %s887_s15, 1  ;;  %s204_s29 = scalar_lea.sflag [#allocation6], %s887_s15 }
  0x56   : > { %s897_s16 = scalar_lea.vmem [#allocation5], %s487_s5 }
  0x57   : > { %687 = dma.done.wait (%p989_p5), %s204_s29, 32  }
  0x58   : > { %689 = vsyncadd (%p989_p5), %s204_s29, 4294967264  ;;  %v241_v0 = vlaneseq  ;;  %s907_s19 = scalar_lea.vmem [#allocation7], %s487_s5  ;;  %v720_v2 = vmov 0.0   ;;  %vm251_vm1 = vcmask 1043456   ;;  %v246_v3 = vld [vmem:[%s198_s6] sm:$0xff]  ;;  %s498_s21 = sshll.u32 %s708_s12, 5 }
  0x59   : > { %v249_v4 = vcombine.high %v246_v3, %v246_v3  ;;  %v252_v5 = vsel %vm251_vm1, %v246_v3, -inf  ;;  %v721_v8 = vmov 839922192   ;;  %v247_v37 = vld [vmem:[%s897_s16] sm:$0x3]  ;;  %s360_s30 = sshll.u32 %s907_s19, 4  ;;  %s923_s27 = scalar_lea.hbm %s977_s2, %s498_s21  ;;  %s925_s30 = int_to_ptr.vmem [resolvable:$true] %s360_s30 }
  0x5a   : > { %vm903_vm0 = vcmp.lt.s32.totalorder %v241_v0, 256  ;;  %v253_v6 = vrot.slane %v252_v5, 4  ;;  %v276_v9 = vunpack.c.l.s4 %v721_v8  ;;  %v267_v14 = vshrl.u32 %v241_v0, 7  ;;  %s344_s28 = scalar_lea.sflag [#allocation4], %s887_s15  ;;  %s630_s25 = scalar_lea.vmem %s925_s30, 32 }
  0x5b   : > { %245 = vst.msk [vmem:[%s907_s19] sm:$0x3] %vm903_vm0, %v720_v2  ;;  %v259_v7 = vsel %vm251_vm1, %v249_v4, -inf  ;;  %v722_v41 = vmov 1966171168   ;;  %p631_p8 = scmp.ne.s32.totalorder %s925_s30, %s630_s25  ;;  %p992_p0 = scmp.ne.s32.totalorder %s982_s22, 0 }
  0x5c   : > { %v254_v10 = vmax.f32 %v252_v5, %v253_v6  ;;  %v260_v11 = vrot.slane %v259_v7, 4  ;;  %v277_v15 = vunpack.c.0.s8 %v276_v9  ;;  %v268_v20 = vcvt.s32.f32 %v267_v14  ;;  %s723_s12 = smov [#allocation7]  }
  0x5d   : > { %v304_v36 = vsub.s32 0, %v267_v14  ;;  %v308_v40 = vsub.s32 1, %v267_v14  ;;  %v323_v42 = vunpack.c.l.s4 %v722_v41  ;;  %p632_p7 = pnand %p631_p8, %p992_p0  ;;  %s634_s3 = sshll.u32 %s723_s12, 4  ;;  %s635_s3 = int_to_ptr.vmem [resolvable:$false] %s634_s3 }
  0x5e   : > { %v255_v12 = vrot.slane %v254_v10, 2  ;;  %v261_v13 = vmax.f32 %v259_v7, %v260_v11  ;;  %v280_v21 = vsub.s32 %v277_v15, %v267_v14  ;;  %s636_s7 = scalar_lea.vmem %s635_s3, 64  ;;  %p637_p10 = scmp.lt.s32.totalorder %s925_s30, %s635_s3 }
  0x5f   : > { %v305_v45 = vrot.slane %v247_v37, %v304_v36  ;;  %v309_v48 = vrot.slane %v247_v37, %v308_v40  ;;  %v324_v49 = vunpack.c.0.s8 %v323_v42  ;;  %p633_p4 = pneg %p632_p7  ;;  %p638_p12 = scmp.lt.s32.totalorder %s636_s7, %s630_s25 }
  0x60   : > { %v256_v16 = vmax.f32 %v254_v10, %v255_v12  ;;  %v262_v17 = vrot.slane %v261_v13, 2  ;;  %v281_v25 = vrot.slane %v268_v20, %v280_v21 }
  0x61   : > { %v327_v52 = vsub.s32 %v324_v49, %v267_v14  ;;  %p639_p1 = por %p638_p12, %p637_p10 }
  0x62   : > { %v257_v18 = vrot.slane %v256_v16, 1  ;;  %v263_v19 = vmax.f32 %v261_v13, %v262_v17  ;;  %v318_v56 = vld [vmem:[%s907_s19] sm:$0x3] }
  0x63   : > { %p640_p2 = pnand %p639_p1, %p633_p4 }
  0x64   : > { %v258_v22 = vmax.f32 %v256_v16, %v257_v18  ;;  %v264_v23 = vrot.slane %v263_v19, 1 }
  0x66   : > { %v265_v24 = vmax.f32 %v263_v19, %v264_v23 }
  0x68   : > { %v271_v26 = vcombine.low %v258_v22, %v265_v24 }
  0x6a   : > { %vm273_vm2 = vcmp.eq.f32.partialorder %v246_v3, %v271_v26 }
  0x6b   : > { %v283_v27 = vsel %vm273_vm2, %v281_v25, 4.0 }
  0x6c   : > { %v285_v28 = vcombine.high %v283_v27, %v283_v27  ;;  %v287_v29 = vsel %vm251_vm1, %v283_v27, inf }
  0x6d   : > { %v288_v30 = vrot.slane %v287_v29, 4 }
  0x6e   : > { %v294_v31 = vsel %vm251_vm1, %v285_v28, inf }
  0x6f   : > { %v289_v32 = vmin.f32 %v287_v29, %v288_v30  ;;  %v295_v33 = vrot.slane %v294_v31, 4 }
  0x71   : > { %v290_v34 = vrot.slane %v289_v32, 2  ;;  %v296_v35 = vmin.f32 %v294_v31, %v295_v33 }
  0x73   : > { %v291_v38 = vmin.f32 %v289_v32, %v290_v34  ;;  %v297_v39 = vrot.slane %v296_v35, 2 }
  0x75   : > { %v292_v43 = vrot.slane %v291_v38, 1  ;;  %v298_v44 = vmin.f32 %v296_v35, %v297_v39 }
  0x77   : > { %v293_v46 = vmin.f32 %v291_v38, %v292_v43  ;;  %v299_v47 = vrot.slane %v298_v44, 1 }
  0x79   : > { %v300_v50 = vmin.f32 %v298_v44, %v299_v47  ;;  %vm312_vm3 = vcmp.eq.f32.partialorder %v293_v46, %v305_v45 }
  0x7a   : > { %v489_v51 = vsel %vm312_vm3, 1.0, %v720_v2 }
  0x7b   : > { %vm313_vm4 = vcmp.eq.f32.partialorder %v300_v50, %v309_v48 }
  0x7c   : > { %v490_v53 = vsel %vm313_vm4, 1.0, %v720_v2 }
  0x7d   : > { %v321_v54 = vcombine.low %v489_v51, %v490_v53 }
  0x7f   : > { %v328_v55 = vrot.slane %v321_v54, %v327_v52 }
  0x81   : > { %v335_v57 = vrot.slane %v328_v55, %v327_v52 }
  0x83   : > { %v337_v58 = vadd.f32 %v335_v57, %v318_v56 }
  0x85   : > { %342 = vst.msk [vmem:[%s907_s19] sm:$0x3] %vm903_vm0, %v337_v58 }
  0x86   : > { %643 = shalt.err (!%p640_p2)
}
  0x87   : > { %s644_s8 = scalar_lea.hbm %s923_s27, 32  ;;  %s648_s4 = scalar_lea.hbm %s977_s2, 64 }
  0x88   : > { %p645_p9 = scmp.ne.s32.totalorder %s923_s27, %s644_s8  ;;  %p649_p6 = scmp.lt.u32.totalorder %s923_s27, %s977_s2 }
  0x89   : > { %p650_p13 = scmp.lt.u32.totalorder %s648_s4, %s644_s8  ;;  %p652_p8 = scmp.lt.u32.totalorder %s644_s8, %s923_s27 }
  0x8a   : > { %p646_p11 = pnand %p645_p9, %p992_p0 }
  0x8b   : > { %p651_p5 = por %p650_p13, %p649_p6 }
  0x8c   : > { %p647_p3 = pneg %p646_p11 }
  0x8d   : > { %p653_p7 = por %p652_p8, %p651_p5 }
  0x8f   : > { %p654_p4 = pnand %p653_p7, %p647_p3 }
  0x91   : > { %657 = shalt.err (!%p654_p4)
}
  0x92   : > { %503 = dma.vmem_to_hbm [thread:$0]  (%p992_p0), %s925_s30, 32, %s923_s27, %s344_s28  }
  0x93 PF: > { %s372_s29 = sand.u32 1, %s696_s9   ;;  %p993_p10 = scmp.ne.s32.totalorder %s983_s24, 0 }
  0x94   : > { %p994_p12 = scmp.ge.s32.totalorder %s716_s14, 2  ;;  %s373_s16 = scalar_lea.sflag [#allocation4], %s372_s29 }
  0x96   : > { %p513_p1 = pnand %p994_p12, %p993_p10 }
  0x98   : > { %691 = dma.done.wait (!%p513_p1), %s373_s16, 32  }
  0x99   : > { %693 = vsyncadd (!%p513_p1), %s373_s16, 4294967264  ;;  %s21_s14 = sadd.s32 1, %s716_s14   ;;  %s995_s9 = smov %s700_s10 }
  0x9a   : > { %p18_p2 = scmp.ge.s32.totalorder %s21_s14, 4   ;;  %s996_s10 = smov %s704_s11 }
  0x9b   : > { %s997_s11 = smov %s795_s23  ;;  %s998_s12 = smov %s712_s13 }
  0x9c   : > { %s999_s13 = smov %s1001_s17  ;;  %20 = sbr.rel (!%p18_p2) target bundleno = 8 (0x8), region = 90 }
  0xa3   :  { %378 = vsyncpa [#allocation3], 1 }
  0xa4   :  { %380 = vsyncpa [#allocation3 + $0x1], 1 }
  0xa5   :  { %381 = vsyncpa [#allocation6], 1 }
  0xa6   :  { %383 = vsyncpa [#allocation6 + $0x1], 1 }
  0xa7   :  { %384 = vsyncpa [#allocation4], 1 }
  0xa8   :  { %386 = vsyncpa [#allocation4 + $0x1], 1 }

</bundles_post_ra>
